<compile_context>
chip_gen: v5e
topology: v5e:2x2
jax: 0.10.0
libtpu: 0.0.40
codegen_flags: <defaults>
</compile_context>

<pallas_src>
import jax
import jax.numpy as jnp
from jax.experimental import pallas as pl
from jax.experimental.pallas import tpu as pltpu

HIDDEN_UNITS = 64
F = 2 * HIDDEN_UNITS  # 128


def fc_kernel(x_ref, wt_ref, b_ref, o_ref):
    # x_ref: (TB, F), wt_ref: (F, F) already transposed to (in, out),
    # b_ref: (1, F), o_ref: (TB, F)
    acc = jnp.dot(x_ref[...], wt_ref[...], preferred_element_type=jnp.float32)
    acc = acc + b_ref[...]
    o_ref[...] = jnp.maximum(acc, 0.0).astype(o_ref.dtype)


def _round8(n):
    return ((n + 7) // 8) * 8


def _pick_tile(batch, tb_max=4096, min_steps=2, tb_min=512):
    """Batch tile: multiple of 8, large enough to amortize the ~0.35 us
    per-step pipeline overhead (this kernel is HBM-bandwidth-bound), capped at
    tb_max, while keeping >= min_steps grid steps on large batches."""
    b8 = _round8(batch)
    if b8 <= tb_min:
        return b8  # single small tile
    tb = min(tb_max, b8)
    target = _round8(pl.cdiv(b8, min_steps))
    return max(tb_min, min(tb, target))


def fc_forward(x, w, b, *, tb_max=4096):
    """x: [B, F] float32; w: [F, F] (PyTorch Linear weight, out x in); b: [F]."""
    B, Fin = x.shape
    assert Fin == F

    tb = _pick_tile(B, tb_max=tb_max)
    grid_n = pl.cdiv(B, tb)  # no padding: Pallas clips the partial last block

    # One-time 64 KiB transpose in the wrapper -> plain MXU contraction in-kernel.
    wt = w.T
    b2 = b.reshape(1, F)

    itemsize = jnp.dtype(x.dtype).itemsize
    bytes_accessed = (
        B * F * itemsize          # x in
        + F * F * itemsize        # weight (resident, read once)
        + F * itemsize            # bias
        + B * F * itemsize        # out
    )
    cost = pl.CostEstimate(
        flops=2 * B * F * F,
        transcendentals=0,
        bytes_accessed=bytes_accessed,
    )

    # VMEM budget: x + out double-buffered, plus resident weight/bias, plus
    # headroom. Capped at 40 MiB to stay well under v7x's 64 MiB per-TC VMEM.
    vmem_need = (
        2 * 2 * tb * F * itemsize
        + 2 * (F * F + F) * itemsize
        + (2 << 20)
    )
    vmem_limit = int(min(max(vmem_need, 16 << 20), 40 << 20))

    out = pl.pallas_call(
        fc_kernel,
        out_shape=jax.ShapeDtypeStruct((B, F), x.dtype),
        grid_spec=pltpu.PrefetchScalarGridSpec(
            num_scalar_prefetch=0,
            grid=(grid_n,),
            in_specs=[
                pl.BlockSpec((tb, F), lambda i: (i, 0)),   # streamed activations
                pl.BlockSpec((F, F), lambda i: (0, 0)),    # weight resident
                pl.BlockSpec((1, F), lambda i: (0, 0)),    # bias resident
            ],
            out_specs=pl.BlockSpec((tb, F), lambda i: (i, 0)),
        ),
        compiler_params=pltpu.CompilerParams(
            dimension_semantics=("parallel",),
            vmem_limit_bytes=vmem_limit,
        ),
        cost_estimate=cost,
    )(x, wt, b2)

    return out


def init_params(key):
    # Deterministic init mirroring nn.Linear's default (Kaiming-uniform-ish).
    kw, kb = jax.random.split(key)
    bound = 1.0 / jnp.sqrt(F)
    w = jax.random.uniform(kw, (F, F), jnp.float32, -bound, bound)
    b = jax.random.uniform(kb, (F,), jnp.float32, -bound, bound)
    return w, b


if __name__ == "__main__":
    key = jax.random.PRNGKey(0)
    kx, kp = jax.random.split(key)

    # Small shape consistent with the module: batch=8 rows of 128 features.
    B = 8
    x = jax.random.normal(kx, (B, F), jnp.float32)
    w, b = init_params(kp)

    y = fc_forward(x, w, b)
    jax.block_until_ready(y)

    y_ref = jnp.maximum(x @ w.T + b, 0.0)
    assert y.shape == (B, F)
    assert jnp.allclose(y, y_ref, atol=1e-5, rtol=1e-5)

    # Larger, non-tile-aligned batch: exercises the multi-step grid and the
    # clipped partial last block (no pad / slice on the wrapper side).
    B2 = 1000
    x2 = jax.random.normal(kx, (B2, F), jnp.float32)
    y2 = fc_forward(x2, w, b)
    jax.block_until_ready(y2)
    y2_ref = jnp.maximum(x2 @ w.T + b, 0.0)
    assert y2.shape == (B2, F)
    assert jnp.allclose(y2, y2_ref, atol=1e-4, rtol=1e-4)

    print("KERNEL_OK")
</pallas_src>

<mosaic_0001>
module attributes {stable_mosaic.version = 11 : i64} {
  func.func @fc_kernel(%arg0: i32, %arg1: memref<8x128xf32, #tpu.memory_space<vmem>>, %arg2: memref<128x128xf32, #tpu.memory_space<vmem>>, %arg3: memref<1x128xf32, #tpu.memory_space<vmem>>, %arg4: memref<8x128xf32, #tpu.memory_space<vmem>>) attributes {dimension_semantics = [#tpu.dimension_semantics<parallel>], iteration_bounds = array<i64: 1>, scalar_prefetch = 0 : i64, scratch_operands = 0 : i64, tpu.core_type = #tpu.core_type<tc>, window_params = [{transform_indices = @transform_0, window_bounds = array<i64: 8, 128>}, {pipeline_mode = #tpu.pipeline_mode<synchronous>, transform_indices = @transform_1, window_bounds = array<i64: 128, 128>}, {pipeline_mode = #tpu.pipeline_mode<synchronous>, transform_indices = @transform_2, window_bounds = array<i64: 1, 128>}, {transform_indices = @transform_3, window_bounds = array<i64: 8, 128>}]} {
    %c0 = arith.constant 0 : index
    %c0_0 = arith.constant 0 : index
    %0 = vector.load %arg1[%c0, %c0_0] : memref<8x128xf32, #tpu.memory_space<vmem>>, vector<8x128xf32>
    %c0_1 = arith.constant 0 : index
    %c0_2 = arith.constant 0 : index
    %1 = vector.load %arg2[%c0_1, %c0_2] : memref<128x128xf32, #tpu.memory_space<vmem>>, vector<128x128xf32>
    %cst = arith.constant dense<0.000000e+00> : vector<8x128xf32>
    %2 = tpu.matmul %0, %1, %cst {dimension_numbers = #tpu.dot_dimension_numbers<[1], [0], [0], [1], [0, 0, 1, 1], [], []>} : vector<8x128xf32>, vector<128x128xf32>, vector<8x128xf32> -> vector<8x128xf32>
    %c0_3 = arith.constant 0 : index
    %c0_4 = arith.constant 0 : index
    %3 = vector.load %arg3[%c0_3, %c0_4] : memref<1x128xf32, #tpu.memory_space<vmem>>, vector<1x128xf32>
    %4 = vector.broadcast %3 : vector<1x128xf32> to vector<8x128xf32>
    %5 = arith.addf %2, %4 : vector<8x128xf32>
    %cst_5 = arith.constant 0.000000e+00 : f32
    %6 = vector.broadcast %cst_5 : f32 to vector<8x128xf32>
    %7 = arith.maximumf %5, %6 : vector<8x128xf32>
    %c0_6 = arith.constant 0 : index
    %c0_7 = arith.constant 0 : index
    %8 = vector.load %arg4[%c0_6, %c0_7] : memref<8x128xf32, #tpu.memory_space<vmem>>, vector<8x128xf32>
    tpu.vector_store %arg4[%c0_6, %c0_7], %7 {strides = array<i32>} : memref<8x128xf32, #tpu.memory_space<vmem>>, vector<8x128xf32>,
    return
  }
  func.func @transform_0(%arg0: i32) -> (i32, i32) {
    %c0_i32 = arith.constant 0 : i32
    %c0_i32_0 = arith.constant 0 : i32
    return %arg0, %c0_i32 : i32, i32
  }
  func.func @transform_1(%arg0: i32) -> (i32, i32) {
    %c0_i32 = arith.constant 0 : i32
    %c0_i32_0 = arith.constant 0 : i32
    %c0_i32_1 = arith.constant 0 : i32
    return %c0_i32, %c0_i32_0 : i32, i32
  }
  func.func @transform_2(%arg0: i32) -> (i32, i32) {
    %c0_i32 = arith.constant 0 : i32
    %c0_i32_0 = arith.constant 0 : i32
    %c0_i32_1 = arith.constant 0 : i32
    return %c0_i32, %c0_i32_0 : i32, i32
  }
  func.func @transform_3(%arg0: i32) -> (i32, i32) {
    %c0_i32 = arith.constant 0 : i32
    %c0_i32_0 = arith.constant 0 : i32
    return %arg0, %c0_i32 : i32, i32
  }
}

</mosaic_0001>

<bundles_post_ra>
// kernel: tpu_custom_call.1
= control target key start
LH: loop header
LB: loop body
LE: loop exit
PB: predicated region body
PF: predicated region fallthrough
CT: control target
= control target key end

     0   :  { %8 = vsyncpa [#allocation3], 0  ;;  %s227_s0 = inlined_call_operand.hbm [shape: f32[8,128], index: 0, kind: input, shape index: {}]   ;;  %s228_s1 = inlined_call_operand.hbm [shape: f32[128,128], index: 1, kind: input, shape index: {}]   ;;  %s229_s2 = inlined_call_operand.vmem [shape: f32[1,128], index: 2, kind: input, shape index: {}]   ;;  %s230_s3 = inlined_call_operand.hbm [shape: f32[8,128], index: 3, kind: output, shape index: {}]  }
   0x1   :  { %9 = vsyncpa [#allocation6], 0 }
   0x2   :  { %10 = vsyncpa [#allocation4], 0  ;;  %s16_s14 = sshll.u32 %s227_s0, 4  ;;  %s190_s15 = smov [#allocation2]   ;;  %s17_s14 = int_to_ptr.hbm [resolvable:$true] %s16_s14 }
   0x3   :  { %s18_s16 = sshll.u32 %s190_s15, 4  ;;  %s26_s19 = sshll.u32 %s228_s1, 4  ;;  %s19_s16 = int_to_ptr.vmem [resolvable:$true] %s18_s16  ;;  %s27_s19 = int_to_ptr.hbm [resolvable:$true] %s26_s19 }
   0x4   :  { %21 = dma.hbm_to_vmem [thread:$0]  %s17_s14, 128, %s19_s16, [#allocation3]  }
   0x5   :  { %s191_s20 = smov [#allocation5]   ;;  %s192_s22 = smov 128  }
   0x6   :  { %s28_s21 = sshll.u32 %s191_s20, 4  ;;  %s193_s23 = smov 8   ;;  %s29_s21 = int_to_ptr.vmem [resolvable:$true] %s28_s21 }
   0x7   :  { %34 = dma.hbm_to_vmem [thread:$0]  %s27_s19, 2048, %s29_s21, [#allocation6], %s192_s22, %s192_s22, %s193_s23  }
   0x8   :  { %184 = dma.done.wait [#allocation3], 128  }
   0x9   :  { %185 = vsyncadd [#allocation3], 4294967168 }
   0xa   :  { %186 = dma.done.wait [#allocation6], 2048  }
   0xb   :  { %187 = vsyncadd [#allocation6], 4294965248  ;;  %v61_v0 = vld [vmem:[#allocation5 + $0x78] sm:$0xff]  ;;  %v60_v1 = vld [vmem:[#allocation5 + $0x70] sm:$0xff]  ;;  %s194_s24 = smov [#allocation7]   ;;  %s95_s28 = sshll.u32 %s230_s3, 4  ;;  %s96_s28 = int_to_ptr.hbm [resolvable:$true] %s95_s28 }
   0xc   :  { %66 = vmatpush.msra.mxu0 %v61_v0  ;;  %v59_v2 = vld [vmem:[#allocation5 + $0x68] sm:$0xff]  ;;  %v58_v3 = vld [vmem:[#allocation5 + $0x60] sm:$0xff]  ;;  %v57_v4 = vld [vmem:[#allocation5 + $0x58] sm:$0xff]  ;;  %s93_s25 = sshll.u32 %s194_s24, 4  ;;  %s94_s25 = int_to_ptr.vmem [resolvable:$true] %s93_s25 }
   0xd   :  { %v56_v5 = vld [vmem:[#allocation5 + $0x50] sm:$0xff]  ;;  %v55_v6 = vld [vmem:[#allocation5 + $0x48] sm:$0xff]  ;;  %v54_v7 = vld [vmem:[#allocation5 + $0x40] sm:$0xff] }
   0xe   :  { %67 = vmatpush.msra.mxu0 %v60_v1  ;;  %v53_v8 = vld [vmem:[#allocation5 + $0x38] sm:$0xff]  ;;  %v52_v9 = vld [vmem:[#allocation5 + $0x30] sm:$0xff]  ;;  %v51_v10 = vld [vmem:[#allocation5 + $0x28] sm:$0xff] }
   0xf   :  { %v50_v11 = vld [vmem:[#allocation5 + $0x20] sm:$0xff]  ;;  %v49_v12 = vld [vmem:[#allocation5 + $0x18] sm:$0xff]  ;;  %v48_v13 = vld [vmem:[#allocation5 + $0x10] sm:$0xff] }
  0x10   :  { %68 = vmatpush.msra.mxu0 %v59_v2  ;;  %v47_v14 = vld [vmem:[#allocation5 + $0x8] sm:$0xff]  ;;  %v46_v15 = vld [vmem:[#allocation5] sm:$0xff]  ;;  %v45_v16 = vld [vmem:[#allocation2] sm:$0xff] }
  0x11   :  { %v111_v17 = vld [vmem:[%s229_s2] ss:$0 sm:$0xff] }
  0x12   :  { %69 = vmatpush.msra.mxu0 %v58_v3 }
  0x14   :  { %70 = vmatpush.msra.mxu0 %v57_v4 }
  0x16   :  { %71 = vmatpush.msra.mxu0 %v56_v5 }
  0x18   :  { %72 = vmatpush.msra.mxu0 %v55_v6 }
  0x1a   :  { %73 = vmatpush.msra.mxu0 %v54_v7 }
  0x1c   :  { %74 = vmatpush.msra.mxu0 %v53_v8 }
  0x1e   :  { %75 = vmatpush.msra.mxu0 %v52_v9 }
  0x20   :  { %76 = vmatpush.msra.mxu0 %v51_v10 }
  0x22   :  { %77 = vmatpush.msra.mxu0 %v50_v11 }
  0x24   :  { %78 = vmatpush.msra.mxu0 %v49_v12 }
  0x26   :  { %79 = vmatpush.msra.mxu0 %v48_v13 }
  0x28   :  { %80 = vmatpush.msra.mxu0 %v47_v14 }
  0x2a   :  { %81 = vmatpush.msra.mxu0 %v46_v15 }
  0x2b   :  { %82 = vmatmul.f32.vlgmr.msra.gmra.mxu0 %v45_v16 }
  0xa8   :  { %v83_v18 = vpop.f32.mrf.mxu0 }
  0xa9   :  { %v84_v19 = vadd.f32 %v111_v17, %v83_v18 }
  0xab   :  { %v86_v20 = vmax.f32 %v84_v19, 0.0 }
  0xad   :  { %87 = vst [vmem:[#allocation7] sm:$0xff] %v86_v20 }
  0xae   :  { %98 = dma.vmem_to_hbm [thread:$0]  %s94_s25, 128, %s96_s28, [#allocation4]  }
  0xaf   :  { %188 = dma.done.wait [#allocation4], 128  }
  0xb0   :  { %189 = vsyncadd [#allocation4], 4294967168 }
  0xb1   :  { %103 = vsyncpa [#allocation3], 1 }
  0xb2   :  { %104 = vsyncpa [#allocation6], 1 }
  0xb3   :  { %105 = vsyncpa [#allocation4], 1 }

</bundles_post_ra>
